<compile_context>
chip_gen: v7x
topology: tpu7x:2x2x1
jax: 0.10.0
libtpu: 0.0.40
codegen_flags: <defaults>
</compile_context>

<pallas_src>
import math

import jax
import jax.numpy as jnp
from jax import lax
from jax.experimental import pallas as pl
from jax.experimental.pallas import tpu as pltpu


def _largest_tile(n, candidates):
    """Largest candidate tile that divides n; falls back to the full dim."""
    for t in candidates:
        if t <= n and n % t == 0:
            return t
    return n


# ---------------------------------------------------------------------------
# Kernel 1: fused QKV projection  ->  head-major [3, B, H, S, DpH] bf16
# ---------------------------------------------------------------------------
def _qkv_proj_kernel(x_ref, w_ref, o_ref):
    # x_ref: (1, tm, D)   w_ref: (1, D, tn)   o_ref: (1, 1, Hb, tm, DpH)
    Hb = o_ref.shape[2]
    DpH = o_ref.shape[4]
    x = x_ref[0].astype(jnp.bfloat16)                     # bf16 MXU operand
    y = jnp.dot(x, w_ref[0], preferred_element_type=jnp.float32)   # (tm, tn)
    # Head-major layout achieved by per-head lane-slice stores (the cheap
    # in-kernel "transpose"); paid once per token instead of per attention step.
    for h in range(Hb):
        o_ref[0, 0, h] = y[:, h * DpH:(h + 1) * DpH].astype(o_ref.dtype)


# ---------------------------------------------------------------------------
# Kernel 2: head-batched causal flash attention over a triangular schedule.
# ---------------------------------------------------------------------------
def _flash_attn_kernel(qi_tab, ki_tab, km_tab, q_ref, k_ref, v_ref, o_ref,
                       m_sc, l_sc, acc_sc):
    t = pl.program_id(1)
    qi = qi_tab[t]
    ki = ki_tab[t]
    H, tq, DpH = acc_sc.shape
    tk = k_ref.shape[3]

    @pl.when(ki == 0)                       # first kv block of this q tile
    def _init():
        m_sc[...] = jnp.full(m_sc.shape, -jnp.inf, jnp.float32)
        l_sc[...] = jnp.zeros(l_sc.shape, jnp.float32)
        acc_sc[...] = jnp.zeros(acc_sc.shape, jnp.float32)

    q = q_ref[0, 0]                         # (H, tq, DpH) bf16, scale folded in
    k = k_ref[0, 0]                         # (H, tk, DpH) bf16
    v = v_ref[0, 0]                         # (H, tk, DpH) bf16

    # Batched q @ k^T across all heads (leading batch dim, no transposes).
    s = jnp.einsum("hqd,hkd->hqk", q, k, preferred_element_type=jnp.float32)

    def _online_softmax_update(scores):
        m_prev = m_sc[...]
        m_new = jnp.maximum(m_prev, jnp.max(scores, axis=-1, keepdims=True))
        alpha = jnp.exp(m_prev - m_new)                 # f32 softmax math
        p = jnp.exp(scores - m_new)
        l_sc[...] = alpha * l_sc[...] + jnp.sum(p, axis=-1, keepdims=True)
        acc_sc[...] = alpha * acc_sc[...] + jnp.einsum(
            "hqk,hkd->hqd", p.astype(v.dtype), v,
            preferred_element_type=jnp.float32)
        m_sc[...] = m_new

    # Fast path: block fully below the diagonal -> no mask work at all.
    fully_below = qi * tq >= ki * tk + (tk - 1)

    @pl.when(fully_below)
    def _fast():
        _online_softmax_update(s)

    @pl.when(jnp.logical_not(fully_below))
    def _diag():
        row = qi * tq + lax.broadcasted_iota(jnp.int32, (tq, tk), 0)
        col = ki * tk + lax.broadcasted_iota(jnp.int32, (tq, tk), 1)
        _online_softmax_update(jnp.where(row >= col, s, -jnp.inf))

    @pl.when(ki == km_tab[t])               # last kv block of this q tile
    def _finalize():
        inv_l = pl.reciprocal(l_sc[...], approx=True)   # EUP slot, ~free
        o = acc_sc[...] * inv_l                          # (H, tq, DpH) f32
        # Lane-dense (tq, D) store: heads concatenated along the lane axis, so
        # the [B, S, D] output needs no further transpose/reshape on the host.
        o_ref[0] = jnp.concatenate(
            [o[h] for h in range(H)], axis=-1).astype(o_ref.dtype)


def self_attention_pallas(x, wq, wk, wv, H):
    """x: [B, S, D]; wq/wk/wv: PyTorch Linear weights [D_out, D_in] (bias=False)."""
    B, S, D = x.shape
    assert D % H == 0
    DpH = D // H
    scale = 1.0 / math.sqrt(DpH)

    # ------------------------- Kernel 1: QKV projection ---------------------
    # Stacked, pre-transposed weights (y = x @ W); softmax scale folded into Wq.
    w3 = jnp.stack([wq.T * scale, wk.T, wv.T], axis=0).astype(jnp.bfloat16)

    tm = _largest_tile(S, (512, 256, 128, 64, 32, 16, 8))
    # Tile the projection's output axis when a per-matrix (D, D) bf16 weight
    # block would be too big to keep resident (v5e/v7x VMEM headroom).
    tn = D
    if D * D * 2 > 8 * 1024 * 1024:
        for cand in (1024, 512, 256, 128):
            if D % cand == 0 and cand % DpH == 0:
                tn = cand
                break
    Hb = tn // DpH
    nN = D // tn
    nS = S // tm

    qkv_hm = pl.pallas_call(
        _qkv_proj_kernel,
        out_shape=jax.ShapeDtypeStruct((3, B, H, S, DpH), jnp.bfloat16),
        grid_spec=pltpu.PrefetchScalarGridSpec(
            num_scalar_prefetch=0,
            grid=(3, nN, B, nS),
            in_specs=[
                pl.BlockSpec((1, tm, D), lambda j, n, b, i: (b, i, 0)),
                pl.BlockSpec((1, D, tn), lambda j, n, b, i: (j, 0, n)),
            ],
            out_specs=pl.BlockSpec((1, 1, Hb, tm, DpH),
                                   lambda j, n, b, i: (j, b, n, i, 0)),
        ),
        compiler_params=pltpu.CompilerParams(
            dimension_semantics=("arbitrary", "arbitrary", "parallel", "parallel")),
    )(x, w3)

    # ----------------- Kernel 2: causal flash attention ---------------------
    tq = _largest_tile(S, (256, 128, 64, 32, 16, 8))
    tk = tq
    # Larger KV tiles amortize per-step overhead; keep the f32 score tile modest.
    for cand in (512, 256, 128):
        if cand > tk and cand <= S and S % cand == 0 and \
                H * tq * cand * 4 <= (4 << 20):
            tk = cand
            break
    nq, nk = S // tq, S // tk

    # Triangular (qi, ki) schedule: above-diagonal blocks are never visited, so
    # neither their grid steps nor their K/V DMAs are ever issued.  ki always
    # starts at 0 for every q tile, keeping the running max finite.
    qi_l, ki_l, km_l = [], [], []
    for qi in range(nq):
        kmax = min(nk - 1, ((qi + 1) * tq - 1) // tk)
        for ki in range(kmax + 1):
            qi_l.append(qi)
            ki_l.append(ki)
            km_l.append(kmax)
    qi_tab = jnp.asarray(qi_l, dtype=jnp.int32)
    ki_tab = jnp.asarray(ki_l, dtype=jnp.int32)
    km_tab = jnp.asarray(km_l, dtype=jnp.int32)
    T = len(qi_l)

    out = pl.pallas_call(
        _flash_attn_kernel,
        out_shape=jax.ShapeDtypeStruct((B, S, D), x.dtype),
        grid_spec=pltpu.PrefetchScalarGridSpec(
            num_scalar_prefetch=3,
            grid=(B, T),
            in_specs=[
                pl.BlockSpec((1, 1, H, tq, DpH),
                             lambda b, t, qt, kt, km: (0, b, 0, qt[t], 0)),
                pl.BlockSpec((1, 1, H, tk, DpH),
                             lambda b, t, qt, kt, km: (1, b, 0, kt[t], 0)),
                pl.BlockSpec((1, 1, H, tk, DpH),
                             lambda b, t, qt, kt, km: (2, b, 0, kt[t], 0)),
            ],
            out_specs=pl.BlockSpec((1, tq, D),
                                   lambda b, t, qt, kt, km: (b, qt[t], 0)),
            scratch_shapes=[
                pltpu.VMEM((H, tq, 1), jnp.float32),     # running max m
                pltpu.VMEM((H, tq, 1), jnp.float32),     # running denom l
                pltpu.VMEM((H, tq, DpH), jnp.float32),   # output accumulator
            ],
        ),
        compiler_params=pltpu.CompilerParams(
            dimension_semantics=("parallel", "arbitrary")),
    )(qi_tab, ki_tab, km_tab, qkv_hm, qkv_hm, qkv_hm)

    return out    # already [B, S, D]; no host-side transpose needed


def self_attention_reference(x, wq, wk, wv, H):
    """Pure-JAX f32 reference mirroring the PyTorch forward (eval mode)."""
    B, S, D = x.shape
    DpH = D // H
    q = (x @ wq.T).reshape(B, S, H, DpH).transpose(0, 2, 1, 3)        # [B,H,S,DpH]
    k = (x @ wk.T).reshape(B, S, H, DpH).transpose(0, 2, 3, 1)        # [B,H,DpH,S]
    v = (x @ wv.T).reshape(B, S, H, DpH).transpose(0, 2, 1, 3)        # [B,H,S,DpH]
    s = (q @ k) / math.sqrt(DpH)                                      # [B,H,S,S]
    mask = jnp.tril(jnp.ones((S, S), dtype=bool))[None, None]
    s = jnp.where(mask, s, -jnp.inf)
    p = jax.nn.softmax(s, axis=-1)
    out = p @ v                                                        # [B,H,S,DpH]
    return out.transpose(0, 2, 1, 3).reshape(B, S, D)


if __name__ == "__main__":
    # Small shapes consistent with the module: D=32, H=4, S=8, B=2.
    B, S, D, H = 2, 8, 32, 4

    key = jax.random.PRNGKey(0)
    kx, kq, kk, kv = jax.random.split(key, 4)

    x = jax.random.normal(kx, (B, S, D), dtype=jnp.float32)
    # PyTorch Linear weights: [D_out, D_in], bias=False.
    wq = jax.random.normal(kq, (D, D), dtype=jnp.float32) * (1.0 / math.sqrt(D))
    wk = jax.random.normal(kk, (D, D), dtype=jnp.float32) * (1.0 / math.sqrt(D))
    wv = jax.random.normal(kv, (D, D), dtype=jnp.float32) * (1.0 / math.sqrt(D))

    out = jax.block_until_ready(self_attention_pallas(x, wq, wk, wv, H))
    ref = self_attention_reference(x, wq, wk, wv, H)

    assert out.shape == (B, S, D), out.shape
    # bf16 MXU operands + approx reciprocal -> relaxed tolerance vs all-f32 ref.
    err = float(jnp.max(jnp.abs(out - ref)))
    assert err < 7.5e-2, err

    print("KERNEL_OK")
</pallas_src>

<mosaic_0001>
module attributes {stable_mosaic.version = 11 : i64} {
  func.func @_qkv_proj_kernel(%arg0: i32, %arg1: i32, %arg2: i32, %arg3: i32, %arg4: memref<1x8x32xf32, #tpu.memory_space<vmem>>, %arg5: memref<1x32x32xbf16, #tpu.memory_space<vmem>>, %arg6: memref<1x1x4x8x8xbf16, #tpu.memory_space<vmem>>) attributes {dimension_semantics = [#tpu.dimension_semantics<arbitrary>, #tpu.dimension_semantics<arbitrary>, #tpu.dimension_semantics<parallel>, #tpu.dimension_semantics<parallel>], iteration_bounds = array<i64: 3, 1, 2, 1>, scalar_prefetch = 0 : i64, scratch_operands = 0 : i64, tpu.core_type = #tpu.core_type<tc>, window_params = [{transform_indices = @transform_0, window_bounds = array<i64: 1, 8, 32>}, {transform_indices = @transform_1, window_bounds = array<i64: 1, 32, 32>}, {transform_indices = @transform_2, window_bounds = array<i64: 1, 1, 4, 8, 8>}]} {
    %c0 = arith.constant 0 : index
    %c0_0 = arith.constant 0 : index
    %c0_1 = arith.constant 0 : index
    %0 = vector.load %arg4[%c0, %c0_0, %c0_1] : memref<1x8x32xf32, #tpu.memory_space<vmem>>, vector<1x8x32xf32>
    %1 = vector.shape_cast %0 : vector<1x8x32xf32> to vector<8x32xf32>
    %2 = arith.truncf %1 : vector<8x32xf32> to vector<8x32xbf16>
    %c0_2 = arith.constant 0 : index
    %c0_3 = arith.constant 0 : index
    %c0_4 = arith.constant 0 : index
    %3 = vector.load %arg5[%c0_2, %c0_3, %c0_4] : memref<1x32x32xbf16, #tpu.memory_space<vmem>>, vector<1x32x32xbf16>
    %4 = vector.shape_cast %3 : vector<1x32x32xbf16> to vector<32x32xbf16>
    %cst = arith.constant dense<0.000000e+00> : vector<8x32xf32>
    %5 = tpu.matmul %2, %4, %cst {dimension_numbers = #tpu.dot_dimension_numbers<[1], [0], [0], [1], [0, 0, 1, 1], [], []>} : vector<8x32xbf16>, vector<32x32xbf16>, vector<8x32xf32> -> vector<8x32xf32>
    %6 = vector.extract_strided_slice %5 {offsets = [0, 0], sizes = [8, 8], strides = [1, 1]} : vector<8x32xf32> to vector<8x8xf32>
    %7 = arith.truncf %6 : vector<8x8xf32> to vector<8x8xbf16>
    %c0_5 = arith.constant 0 : index
    %c0_6 = arith.constant 0 : index
    %c0_7 = arith.constant 0 : index
    %c0_8 = arith.constant 0 : index
    %c0_9 = arith.constant 0 : index
    %8 = vector.load %arg6[%c0_5, %c0_6, %c0_7, %c0_8, %c0_9] : memref<1x1x4x8x8xbf16, #tpu.memory_space<vmem>>, vector<1x1x1x8x8xbf16>
    %9 = vector.shape_cast %8 : vector<1x1x1x8x8xbf16> to vector<8x8xbf16>
    %10 = vector.shape_cast %7 : vector<8x8xbf16> to vector<1x1x1x8x8xbf16>
    tpu.vector_store %arg6[%c0_5, %c0_6, %c0_7, %c0_8, %c0_9], %10 {strides = array<i32>} : memref<1x1x4x8x8xbf16, #tpu.memory_space<vmem>>, vector<1x1x1x8x8xbf16>,
    %11 = vector.extract_strided_slice %5 {offsets = [0, 8], sizes = [8, 8], strides = [1, 1]} : vector<8x32xf32> to vector<8x8xf32>
    %12 = arith.truncf %11 : vector<8x8xf32> to vector<8x8xbf16>
    %c0_10 = arith.constant 0 : index
    %c0_11 = arith.constant 0 : index
    %c1 = arith.constant 1 : index
    %c0_12 = arith.constant 0 : index
    %c0_13 = arith.constant 0 : index
    %13 = vector.load %arg6[%c0_10, %c0_11, %c1, %c0_12, %c0_13] : memref<1x1x4x8x8xbf16, #tpu.memory_space<vmem>>, vector<1x1x1x8x8xbf16>
    %14 = vector.shape_cast %13 : vector<1x1x1x8x8xbf16> to vector<8x8xbf16>
    %15 = vector.shape_cast %12 : vector<8x8xbf16> to vector<1x1x1x8x8xbf16>
    tpu.vector_store %arg6[%c0_10, %c0_11, %c1, %c0_12, %c0_13], %15 {strides = array<i32>} : memref<1x1x4x8x8xbf16, #tpu.memory_space<vmem>>, vector<1x1x1x8x8xbf16>,
    %16 = vector.extract_strided_slice %5 {offsets = [0, 16], sizes = [8, 8], strides = [1, 1]} : vector<8x32xf32> to vector<8x8xf32>
    %17 = arith.truncf %16 : vector<8x8xf32> to vector<8x8xbf16>
    %c0_14 = arith.constant 0 : index
    %c0_15 = arith.constant 0 : index
    %c2 = arith.constant 2 : index
    %c0_16 = arith.constant 0 : index
    %c0_17 = arith.constant 0 : index
    %18 = vector.load %arg6[%c0_14, %c0_15, %c2, %c0_16, %c0_17] : memref<1x1x4x8x8xbf16, #tpu.memory_space<vmem>>, vector<1x1x1x8x8xbf16>
    %19 = vector.shape_cast %18 : vector<1x1x1x8x8xbf16> to vector<8x8xbf16>
    %20 = vector.shape_cast %17 : vector<8x8xbf16> to vector<1x1x1x8x8xbf16>
    tpu.vector_store %arg6[%c0_14, %c0_15, %c2, %c0_16, %c0_17], %20 {strides = array<i32>} : memref<1x1x4x8x8xbf16, #tpu.memory_space<vmem>>, vector<1x1x1x8x8xbf16>,
    %21 = vector.extract_strided_slice %5 {offsets = [0, 24], sizes = [8, 8], strides = [1, 1]} : vector<8x32xf32> to vector<8x8xf32>
    %22 = arith.truncf %21 : vector<8x8xf32> to vector<8x8xbf16>
    %c0_18 = arith.constant 0 : index
    %c0_19 = arith.constant 0 : index
    %c3 = arith.constant 3 : index
    %c0_20 = arith.constant 0 : index
    %c0_21 = arith.constant 0 : index
    %23 = vector.load %arg6[%c0_18, %c0_19, %c3, %c0_20, %c0_21] : memref<1x1x4x8x8xbf16, #tpu.memory_space<vmem>>, vector<1x1x1x8x8xbf16>
    %24 = vector.shape_cast %23 : vector<1x1x1x8x8xbf16> to vector<8x8xbf16>
    %25 = vector.shape_cast %22 : vector<8x8xbf16> to vector<1x1x1x8x8xbf16>
    tpu.vector_store %arg6[%c0_18, %c0_19, %c3, %c0_20, %c0_21], %25 {strides = array<i32>} : memref<1x1x4x8x8xbf16, #tpu.memory_space<vmem>>, vector<1x1x1x8x8xbf16>,
    return
  }
  func.func @transform_0(%arg0: i32, %arg1: i32, %arg2: i32, %arg3: i32) -> (i32, i32, i32) {
    %c0_i32 = arith.constant 0 : i32
    %c0_i32_0 = arith.constant 0 : i32
    return %arg2, %arg3, %c0_i32 : i32, i32, i32
  }
  func.func @transform_1(%arg0: i32, %arg1: i32, %arg2: i32, %arg3: i32) -> (i32, i32, i32) {
    %c0_i32 = arith.constant 0 : i32
    %c0_i32_0 = arith.constant 0 : i32
    return %arg0, %c0_i32, %arg1 : i32, i32, i32
  }
  func.func @transform_2(%arg0: i32, %arg1: i32, %arg2: i32, %arg3: i32) -> (i32, i32, i32, i32, i32) {
    %c0_i32 = arith.constant 0 : i32
    %c0_i32_0 = arith.constant 0 : i32
    return %arg0, %arg2, %arg1, %arg3, %c0_i32 : i32, i32, i32, i32, i32
  }
}

</mosaic_0001>

<bundles_post_ra>
// kernel: tpu_custom_call.1
= control target key start
LH: loop header
LB: loop body
LE: loop exit
PB: predicated region body
PF: predicated region fallthrough
CT: control target
= control target key end

     0   :  { %s1218_s0 = inlined_call_operand.hbm [shape: f32[2,8,32], index: 0, kind: input, shape index: {}]   ;;  %s1219_s1 = inlined_call_operand.hbm [shape: bf16[3,32,32], index: 1, kind: input, shape index: {}]   ;;  %s1220_s2 = inlined_call_operand.hbm [shape: bf16[3,2,4,8,8], index: 2, kind: output, shape index: {}]  }
   0x1   :  { %1228 = sst [smem:[#allocation17_spill]] %s1218_s0 }
   0x2   :  { %7 = vsyncpa [#allocation3], 0 }
   0x3   :  { %9 = vsyncpa [#allocation3 + $0x1], 0 }
   0x4   :  { %10 = vsyncpa [#allocation6], 0 }
   0x5   :  { %12 = vsyncpa [#allocation6 + $0x1], 0 }
   0x6   :  { %13 = vsyncpa [#allocation4], 0 }
   0x7   :  { %15 = vsyncpa [#allocation4 + $0x1], 0  ;;  %s883_s9 = smov 0   ;;  %s885_s10 = smov 0  }
   0x8   :  { %s887_s11 = smov 0   ;;  %s889_s12 = smov 0  }
   0x9   :  { %s891_s13 = smov 0   ;;  %s893_s14 = smov 0  }
   0xa   :  { %s895_s15 = smov 0   ;;  %s897_s16 = smov 0  }
   0xb   :  { %s899_s17 = smov 0   ;;  %s901_s18 = smov 0  }
   0xc   :  { %s903_s19 = smov 0   ;;  %s905_s20 = smov 0  }
   0xd   :  { %s907_s21 = smov 0   ;;  %s909_s22 = smov 0  }
   0xe LB: > { %1229 = sst [smem:[#allocation11_spill]] %s846_s20  ;;  %s463_s23 = sadd.s32 4294967295, %s854_s22   ;;  %s854_s22 = sphi %s909_s22, %s21_s22   ;;  %s850_s21 = sphi %s907_s21, %s1257_s21   ;;  %s846_s20 = sphi %s905_s20, %s1256_s20   ;;  %s842_s19 = sphi %s903_s19, %s1255_s19   ;;  %s838_s18 = sphi %s901_s18, %s1254_s18   ;;  %s834_s17 = sphi %s899_s17, %s1266_s17   ;;  %s830_s16 = sphi %s897_s16, %s1265_s16   ;;  %s826_s15 = sphi %s895_s15, %s1264_s15   ;;  %s822_s14 = sphi %s893_s14, %s1263_s14   ;;  %s818_s13 = sphi %s891_s13, %s1262_s13   ;;  %s814_s12 = sphi %s889_s12, %s1261_s12   ;;  %s810_s11 = sphi %s887_s11, %s1260_s11   ;;  %s806_s10 = sphi %s885_s10, %s1259_s10   ;;  %s802_s9 = sphi %s883_s9, %s1258_s9  }
   0xf   : > { %1230 = sst [smem:[#allocation12_spill]] %s850_s21  ;;  %s464_s24 = sadd.s32 4294967294, %s854_s22  }
  0x10   : > { %s39_s25 = sadd.s32 1, %s846_s20  ;;  %s47_s26 = sadd.s32 1, %s850_s21 }
  0x11   : > { %p41_p0 = scmp.ge.s32.totalorder %s39_s25, 2  ;;  %s56_s27 = sadd.s32 1, %s834_s17 }
  0x12   : > { %p63_p1 = scmp.ne.s32.totalorder %s834_s17, %s830_s16  ;;  %p64_p2 = scmp.eq.s32.totalorder %s854_s22, 0 }
  0x13   : > { %s1268_s25 = smov (%p41_p0, %s39_s25), 0  ;;  %s1270_s26 = smov (!%p41_p0, %s47_s26), %s850_s21 }
  0x14   : > { %1231 = sst [smem:[#allocation13_spill]] %s1268_s25  ;;  %s51_s28 = ssub.s32 %s846_s20, %s1268_s25 }
  0x15   : > { %p966_p3 = por %p64_p2, %p63_p1  ;;  %p49_p4 = scmp.ge.s32.totalorder %s1270_s26, 3 }
  0x16   : > { %p54_p5 = scmp.eq.s32.totalorder %s51_s28, 0  ;;  %p69_p6 = scmp.ne.s32.totalorder %s830_s16, %s826_s15 }
  0x17   : > { %p70_p7 = scmp.eq.s32.totalorder %s463_s23, 0  ;;  %s1272_s26 = smov (%p49_p4, %s1270_s26), 0 }
  0x18   : > { %1233 = sst [smem:[#allocation14_spill]] %s1272_s26  ;;  %s79_s4 = ssub.s32 %s850_s21, %s1272_s26 }
  0x19   : > { %s976_s30 = scalar_select %p54_p5, %s834_s17, %s56_s27  }
  0x1a   : > { %p978_p8 = por %p70_p7, %p69_p6  ;;  %p82_p9 = scmp.eq.s32.totalorder %s79_s4, 0 }
  0x1b   : > { %1234 = sst [smem:[#allocation15_spill]] %s976_s30  ;;  %s84_s5 = sadd.s32 1, %s822_s14 }
  0x1c   : > { %s1235_s3 = scalar_select %p978_p8, 1, 0 }
  0x1d   : > { %p91_p10 = scmp.ne.s32.totalorder %s822_s14, %s818_s13  ;;  %p97_p11 = scmp.ne.s32.totalorder %s818_s13, %s814_s12 }
  0x1e   : > { %s990_s6 = scalar_select %p82_p9, %s822_s14, %s84_s5  }
  0x1f   : > { %p994_p12 = por %p91_p10, %p64_p2  ;;  %p998_p13 = por %p97_p11, %p70_p7 }
  0x20   : > { %1236 = sst [smem:[#allocation16_spill]] %s990_s6  ;;  %s109_s15 = sor.u32 %s79_s4, %s51_s28 }
  0x21   : > { %s1238_s8 = scalar_select %p998_p13, 1, 0 }
  0x22   : > { %s116_s27 = sadd.s32 1, %s810_s11  ;;  %p114_p0 = scmp.eq.s32.totalorder %s109_s15, 0 }
  0x23   : > { %p126_p1 = scmp.ne.s32.totalorder %s810_s11, %s806_s10  ;;  %p127_p4 = scmp.eq.s32.totalorder %s463_s23, 5 }
  0x24   : > { %p132_p5 = scmp.ne.s32.totalorder %s806_s10, %s802_s9  ;;  %p133_p6 = scmp.eq.s32.totalorder %s464_s24, 5 }
  0x25   : > { %s1010_s12 = scalar_select %p114_p0, %s810_s11, %s116_s27  }
  0x26   : > { %p1012_p2 = por %p127_p4, %p126_p1  ;;  %p519_p7 = scmp.lt.s32.totalorder %s854_s22, 6 }
  0x27   : > { %p1019_p9 = por %p133_p6, %p132_p5  ;;  %s153_s4 = sand.u32 1, %s834_s17  }
  0x28   : > { %s1239_s5 = scalar_select %p1012_p2, 1, 0 }
  0x29   : > { %s1240_s28 = scalar_select %p1019_p9, 1, 0 }
  0x2a   : > { %s467_s15 = sshll.u32 %s153_s4, 3  ;;  %s468_s26 = sshll.u32 %s846_s20, 7 }
  0x2b   : > { %s1241_s0 = sld [smem:[#allocation17_spill]]  ;;  %s157_s27 = scalar_lea.vmem [#allocation2], %s467_s15 }
  0x2c   : > { %s165_s6 = sshll.u32 %s157_s27, 4  ;;  %p1034_p10 = pnand %p519_p7, %p966_p3  ;;  %s1030_s6 = int_to_ptr.vmem [resolvable:$true] %s165_s6 }
  0x2d   : > { %p1040_p11 = pnand %p519_p7, %p994_p12 }
  0x2e   : > { %p646_p5 = pneg %p1034_p10 }
  0x31   : > { %s1028_s30 = scalar_lea.hbm %s1241_s0, %s468_s26  ;;  %s154_s26 = scalar_lea.sflag [#allocation3], %s153_s4 }
  0x32   : > { %s644_s15 = scalar_lea.hbm %s1028_s30, 128  ;;  %s649_s7 = scalar_lea.hbm %s1241_s0, 256 }
  0x33   : > { %p645_p4 = scmp.ne.s32.totalorder %s1028_s30, %s644_s15  ;;  %p650_p12 = scmp.lt.u32.totalorder %s1028_s30, %s1241_s0 }
  0x34   : > { %p651_p7 = scmp.lt.u32.totalorder %s649_s7, %s644_s15  ;;  %p653_p1 = scmp.lt.u32.totalorder %s644_s15, %s1028_s30 }
  0x35   : > { %p647_p3 = pnand %p646_p5, %p645_p4 }
  0x36   : > { %p652_p0 = por %p651_p7, %p650_p12 }
  0x37   : > { %p648_p6 = pneg %p647_p3 }
  0x38   : > { %p654_p9 = por %p653_p1, %p652_p0 }
  0x3a   : > { %p655_p2 = pnand %p654_p9, %p648_p6 }
  0x3c   : > { %658 = shalt.err (!%p655_p2)
}
  0x3d   : > { %s659_s4 = scalar_lea.vmem %s1030_s6, 128  ;;  %s856_s29 = smov [#allocation2]  }
  0x3e   : > { %p660_p4 = scmp.ne.s32.totalorder %s1030_s6, %s659_s4  ;;  %s664_s23 = sshll.u32 %s856_s29, 4  ;;  %s665_s23 = int_to_ptr.vmem [resolvable:$false] %s664_s23 }
  0x3f   : > { %s666_s20 = scalar_lea.vmem %s665_s23, 256  ;;  %p667_p8 = scmp.lt.s32.totalorder %s1030_s6, %s665_s23 }
  0x40   : > { %p662_p3 = pnand %p660_p4, %p646_p5  ;;  %p668_p12 = scmp.lt.s32.totalorder %s666_s20, %s659_s4 }
  0x42   : > { %p663_p13 = pneg %p662_p3  ;;  %p669_p7 = por %p668_p12, %p667_p8 }
  0x44   : > { %p670_p0 = pnand %p669_p7, %p663_p13 }
  0x46   : > { %673 = shalt.err (!%p670_p0)
}
  0x47   : > { %511 = dma.hbm_to_vmem [thread:$0]  (!%p1034_p10), %s1028_s30, 128, %s1030_s6, %s154_s26  }
  0x48   : > { %p1244_p2 = scmp.lt.s32.totalorder %s854_s22, 7  ;;  %p1245_p9 = scmp.ge.s32.totalorder %s854_s22, 1 }
  0x49   : > { %s172_s7 = sand.u32 1, %s822_s14   ;;  %s489_s27 = sshll.u32 %s850_s21, 8 }
  0x4a   : > { %p1075_p1 = pnand %p1245_p9, %p1244_p2  ;;  %s469_s4 = sshll.u32 %s172_s7, 4 }
  0x4b   : > { %s1084_s23 = scalar_lea.hbm %s1219_s1, %s489_s27  ;;  %s176_s20 = scalar_lea.vmem [#allocation5], %s469_s4 }
  0x4c   : > { %s184_s30 = sshll.u32 %s176_s20, 4  ;;  %s1088_s6 = scalar_lea.sflag [#allocation6], %s172_s7  ;;  %s1086_s30 = int_to_ptr.vmem [resolvable:$true] %s184_s30 }
  0x4d   : > { %s674_s26 = scalar_lea.hbm %s1084_s23, 256  ;;  %p676_p13 = pneg %p1040_p11 }
  0x4e   : > { %p675_p8 = scmp.ne.s32.totalorder %s1084_s23, %s674_s26  ;;  %s679_s24 = scalar_lea.hbm %s1219_s1, 768 }
  0x4f   : > { %p680_p6 = scmp.lt.u32.totalorder %s1084_s23, %s1219_s1  ;;  %p681_p4 = scmp.lt.u32.totalorder %s679_s24, %s674_s26 }
  0x50   : > { %p677_p10 = pnand %p676_p13, %p675_p8  ;;  %p683_p12 = scmp.lt.u32.totalorder %s674_s26, %s1084_s23 }
  0x51   : > { %p682_p3 = por %p681_p4, %p680_p6 }
  0x52   : > { %p678_p5 = pneg %p677_p10 }
  0x53   : > { %p684_p7 = por %p683_p12, %p682_p3 }
  0x55   : > { %p685_p0 = pnand %p684_p7, %p678_p5 }
  0x57   : > { %688 = shalt.err (!%p685_p0)
}
  0x58   : > { %s689_s7 = scalar_lea.vmem %s1086_s30, 256  ;;  %s857_s4 = smov [#allocation5]  }
  0x59   : > { %p690_p2 = scmp.ne.s32.totalorder %s1086_s30, %s689_s7  ;;  %s694_s20 = sshll.u32 %s857_s4, 4  ;;  %s695_s20 = int_to_ptr.vmem [resolvable:$false] %s694_s20 }
  0x5a   : > { %s696_s0 = scalar_lea.vmem %s695_s20, 512  ;;  %p697_p10 = scmp.lt.s32.totalorder %s1086_s30, %s695_s20 }
  0x5b   : > { %p692_p9 = pnand %p690_p2, %p676_p13  ;;  %p698_p6 = scmp.lt.s32.totalorder %s696_s0, %s689_s7 }
  0x5d   : > { %p693_p8 = pneg %p692_p9  ;;  %p699_p4 = por %p698_p6, %p697_p10 }
  0x5f   : > { %p700_p3 = pnand %p699_p4, %p693_p8 }
  0x61   : > { %703 = shalt.err (!%p700_p3)
}
  0x62   : > { %s858_s21 = smov 64   ;;  %s859_s26 = smov 4  }
  0x63   : > { %514 = dma.hbm_to_vmem [thread:$0]  (!%p1040_p11), %s1084_s23, 256, %s1086_s30, %s1088_s6, %s858_s21, %s858_s21, %s859_s26  }
  0x64   : > { %196 = sbr.rel (%p1075_p1) target bundleno = 469 (0x1d5), region = 28  ;;  %s198_s27 = sand.u32 (!%p1075_p1), 1, %s830_s16  }
  0x65   : > { %s473_s29 = sshll.u32 (!%p1075_p1), %s198_s27, 3  ;;  %s199_s24 = scalar_lea.sflag (!%p1075_p1), [#allocation3], %s198_s27 }
  0x66   : > { %s202_s7 = scalar_lea.vmem (!%p1075_p1), [#allocation2], %s473_s29  ;;  %p1247_p13 = scmp.ne.s32.totalorder (!%p1075_p1), %s1235_s3, 0 }
  0x6b   : > { %789 = dma.done.wait (%p1247_p13), %s199_s24, 128  }
  0x6c   : > { %791 = vsyncadd (%p1247_p13), %s199_s24, 4294967168  ;;  %s207_s4 = sand.u32 1, %s818_s13   ;;  %p1248_p11 = scmp.ne.s32.totalorder %s1238_s8, 0 }
  0x6d   : > { %s474_s20 = sshll.u32 %s207_s4, 4  ;;  %s208_s25 = scalar_lea.sflag [#allocation6], %s207_s4 }
  0x6e   : > { %s211_s23 = scalar_lea.vmem [#allocation5], %s474_s20 }
  0x6f   : > { %793 = dma.done.wait (%p1248_p11), %s208_s25, 256  }
  0x70   : > { %795 = vsyncadd (%p1248_p11), %s208_s25, 4294967040  ;;  %v860_v0 = vmov 0.0   ;;  %vm861_vm0 = vmmov 0   ;;  %v642_v1 = vld [vmem:[%s211_s23] sm:$0xff]   ;;  %v643_v2 = vld [vmem:[%s211_s23 + $0x8] sm:$0xff]   ;;  %vm257_vm1 = vcmask 261120  }
  0x71   : > { %494 = vmatprep.subr.bf16.mxu0 %v860_v0  ;;  %498 = vmatprep.mubr.msk.bf16.mxu0 %vm861_vm0, %v860_v0  ;;  %v239_v3 = vld [vmem:[%s202_s7] sm:$0xff]  ;;  %s234_s3 = sand.u32 1, %s806_s10   ;;  %vm302_vm2 = vcmask 60416   ;;  %s862_s8 = smov 104  }
  0x72   : > { %495 = vmatpush3.bf16.msra.mxu0 %v642_v1  ;;  %v240_v4 = vpack.c.bf16 %v239_v3, %v239_v3  ;;  %s475_s15 = sshll.u32 %s234_s3, 4  ;;  %s863_s30 = smov 120  }
  0x73   : > { %496 = vmatprep.subr.bf16.mxu0 %v860_v0  ;;  %s236_s6 = scalar_lea.vmem [#allocation7], %s475_s15  ;;  %s864_s0 = smov 112  }
  0x74   : > { %s484_s21 = sshll.u32 %s838_s18, 2  ;;  %s485_s26 = sshll.u32 %s842_s19, 3 }
  0x75   : > { %s338_s27 = sadd.s32 %s485_s26, %s484_s21  ;;  %s341_s29 = sshll.u32 %s236_s6, 4  ;;  %s1134_s29 = int_to_ptr.vmem [resolvable:$true] %s341_s29 }
  0x76   : > { %497 = vmatpush3.bf16.msra.mxu0 %v643_v2  ;;  %s486_s24 = sshll.u32 %s338_s27, 6  ;;  %s1142_s19 = scalar_lea.sflag [#allocation4], %s234_s3 }
  0x77   : > { %s1139_s18 = scalar_lea.hbm %s1220_s2, %s486_s24  ;;  %s704_s20 = scalar_lea.vmem %s1134_s29, 256 }
  0x78   : > { %p705_p1 = scmp.ne.s32.totalorder %s1134_s29, %s704_s20  ;;  %p1249_p5 = scmp.ne.s32.totalorder %s1239_s5, 0 }
  0x79   : > { %499 = vmatmul.mubr.msk.bf16.vlgmr.msra.gmra.mrb[0].mxu0 %vm257_vm1, %v240_v4  ;;  %s865_s25 = smov [#allocation7]  }
  0x7a   : > { %p706_p12 = pnand %p705_p1, %p1249_p5  ;;  %s708_s23 = sshll.u32 %s865_s25, 4  ;;  %s709_s23 = int_to_ptr.vmem [resolvable:$false] %s708_s23 }
  0x7b   : > { %s710_s15 = scalar_lea.vmem %s709_s23, 512  ;;  %p711_p0 = scmp.lt.s32.totalorder %s1134_s29, %s709_s23 }
  0x7c   : > { %p707_p7 = pneg %p706_p12  ;;  %p712_p2 = scmp.lt.s32.totalorder %s710_s15, %s704_s20 }
  0x7e   : > { %p713_p9 = por %p712_p2, %p711_p0 }
  0x80   : > { %p714_p8 = pnand %p713_p9, %p707_p7 }
 0x14c   : > { %v295_v5 = vpop.f32.mrb[0].mxu0 }
 0x14d   : > { %v301_v6 = vpack.c.bf16 %v295_v5, %v295_v5  ;;  %v500_v7 = vpop.f32.mrb[1].mxu0 }
 0x14e   : > { %v298_v8 = vpop.f32.mrb[2].mxu0 }
 0x14f   : > { %317 = vrot.lane.b32.xlu1 %v301_v6, %s862_s8  ;;  %307 = vrot.lane.b32.xlu0 %v301_v6, %s863_s30  ;;  %v501_v9 = vpop.f32.mrb[3].mxu0  ;;  %303 = vst.msk [vmem:[%s236_s6] sm:$0xf] %vm302_vm2, %v301_v6 }
 0x153   : > { %312 = vrot.lane.b32.xlu0 %v301_v6, %s864_s0 }
 0x1c1   : > { %v318_v10 = vpop.permute.xlu1 %317  ;;  %v308_v11 = vpop.permute.xlu0 %307 }
 0x1c2   : > { %482 = vst.msk [vmem:[%s236_s6 + $0xc] sm:$0xf] %vm302_vm2, %v318_v10  ;;  %480 = vst.msk [vmem:[%s236_s6 + $0x4] sm:$0xf] %vm302_vm2, %v308_v11 }
 0x1c5   : > { %v313_v12 = vpop.permute.xlu0 %312 }
 0x1c6   : > { %481 = vst.msk [vmem:[%s236_s6 + $0x8] sm:$0xf] %vm302_vm2, %v313_v12 }
 0x1c7   : > { %717 = shalt.err (!%p714_p8)
}
 0x1c8   : > { %s718_s3 = scalar_lea.hbm %s1139_s18, 256  ;;  %s722_s6 = scalar_lea.hbm %s1220_s2, 1536 }
 0x1c9   : > { %p719_p10 = scmp.ne.s32.totalorder %s1139_s18, %s718_s3  ;;  %p723_p3 = scmp.lt.u32.totalorder %s1139_s18, %s1220_s2 }
 0x1ca   : > { %p724_p13 = scmp.lt.u32.totalorder %s722_s6, %s718_s3  ;;  %p726_p1 = scmp.lt.u32.totalorder %s718_s3, %s1139_s18 }
 0x1cb   : > { %p720_p6 = pnand %p719_p10, %p1249_p5 }
 0x1cc   : > { %p725_p11 = por %p724_p13, %p723_p3 }
 0x1cd   : > { %p721_p4 = pneg %p720_p6 }
 0x1ce   : > { %p727_p12 = por %p726_p1, %p725_p11 }
 0x1d0   : > { %p728_p7 = pnand %p727_p12, %p721_p4 }
 0x1d2   : > { %731 = shalt.err (!%p728_p7)
}
 0x1d3   : > { %s866_s26 = smov 64   ;;  %s867_s27 = smov 4  }
 0x1d4   : > { %506 = dma.vmem_to_hbm [thread:$0]  (%p1249_p5), %s1134_s29, 256, %s1139_s18, %s1142_s19, %s866_s26, %s866_s26, %s867_s27  }
 0x1d5 PF: > { %p520_p0 = scmp.ge.s32.totalorder %s854_s22, 2  ;;  %s356_s24 = sand.u32 1, %s802_s9  }
 0x1d6   : > { %p1250_p2 = scmp.ne.s32.totalorder %s1240_s28, 0  ;;  %s357_s7 = scalar_lea.sflag [#allocation4], %s356_s24 }
 0x1d8   : > { %p516_p9 = pnand %p520_p0, %p1250_p2 }
 0x1da   : > { %797 = dma.done.wait (!%p516_p9), %s357_s7, 256  }
 0x1db   : > { %799 = vsyncadd (!%p516_p9), %s357_s7, 4294967040  ;;  %s21_s22 = sadd.s32 1, %s854_s22   ;;  %s1252_s5 = sld [smem:[#allocation16_spill]] }
 0x1dc   : > { %p1171_p8 = scmp.ge.s32.totalorder %s21_s22, 8   ;;  %s1253_s29 = sld [smem:[#allocation15_spill]] }
 0x1dd   : > { %s1254_s18 = sld [smem:[#allocation11_spill]]  ;;  %s1255_s19 = sld [smem:[#allocation12_spill]] }
 0x1de   : > { %s1256_s20 = sld [smem:[#allocation13_spill]]  ;;  %s1257_s21 = sld [smem:[#allocation14_spill]] }
 0x1df   : > { %s1258_s9 = smov %s806_s10  ;;  %s1259_s10 = smov %s810_s11 }
 0x1e0   : > { %s1260_s11 = smov %s1010_s12  ;;  %s1261_s12 = smov %s818_s13 }
 0x1e1   : > { %s1262_s13 = smov %s822_s14  ;;  %s1263_s14 = smov %s1252_s5 }
 0x1e2   : > { %s1264_s15 = smov %s830_s16  ;;  %s1265_s16 = smov %s834_s17 }
 0x1e3   : > { %s1266_s17 = smov %s1253_s29  ;;  %20 = sbr.rel (!%p1171_p8) target bundleno = 14 (0xe), region = 89 }
 0x1ea   :  { %362 = vsyncpa [#allocation3], 1 }
 0x1eb   :  { %364 = vsyncpa [#allocation3 + $0x1], 1 }
 0x1ec   :  { %365 = vsyncpa [#allocation6], 1 }
 0x1ed   :  { %367 = vsyncpa [#allocation6 + $0x1], 1 }
 0x1ee   :  { %368 = vsyncpa [#allocation4], 1 }
 0x1ef   :  { %370 = vsyncpa [#allocation4 + $0x1], 1 }

</bundles_post_ra>
